<compile_context>
chip_gen: v5e
topology: v5e:2x2
jax: 0.10.0
libtpu: 0.0.40
codegen_flags: <defaults>
</compile_context>

<pallas_src>
import jax
import jax.numpy as jnp
from jax.experimental import pallas as pl
from jax.experimental.pallas import tpu as pltpu


def _linear_head_kernel(x_ref, w_ref, b_ref, o_ref):
    # x_ref: (TM, D)  VMEM   batch tile of input features
    # w_ref: (1, D)   VMEM   nn.Linear weight row (resident across grid steps)
    # b_ref: (1, 1)   SMEM   scalar bias
    # o_ref: (TM, 1)  VMEM   output logits for this tile
    x = x_ref[...].astype(jnp.float32)
    w = w_ref[...].astype(jnp.float32)          # broadcasts (1, D) against (TM, D)
    acc = jnp.sum(x * w, axis=-1, keepdims=True)  # VPU mul + XLU lane reduce
    o_ref[...] = (acc + b_ref[0, 0]).astype(o_ref.dtype)


def _pick_tile(B, D, itemsize, max_bytes_per_buf=8 * 1024 * 1024):
    """Largest batch tile with one x buffer <= ~8 MiB (x2 for double buffering)."""
    bytes_per_row = max(D * itemsize, 1)
    tm = max(8, min(B, max_bytes_per_buf // bytes_per_row))
    if tm >= B:
        return B                     # single block covering the full batch
    return max(8, (tm // 8) * 8)     # multiple of 8 for sublane alignment


def binomial_regression_head_forward(x, weight, bias, *, tm=None):
    """Pallas forward pass of BinomialRegressionHead.

    Args:
      x:      (B, D) float input features.
      weight: (1, D) float (PyTorch nn.Linear weight layout; used as-is, no transpose).
      bias:   (1,)   float (PyTorch nn.Linear bias).
      tm:     optional batch tile size override.

    Returns:
      logits: (B,) float32
    """
    B, D = x.shape
    if tm is None:
        tm = _pick_tile(B, D, jnp.dtype(x.dtype).itemsize)
    tm = min(tm, B)

    w_row = weight.reshape(1, D).astype(jnp.float32)
    b2 = bias.reshape(1, 1).astype(jnp.float32)

    out = pl.pallas_call(
        _linear_head_kernel,
        out_shape=jax.ShapeDtypeStruct((B, 1), jnp.float32),
        grid=(pl.cdiv(B, tm),),
        in_specs=[
            pl.BlockSpec((tm, D), lambda i: (i, 0)),                 # streamed x tiles
            pl.BlockSpec((1, D), lambda i: (0, 0)),                  # resident weight row
            pl.BlockSpec(memory_space=pltpu.MemorySpace.SMEM),       # scalar bias in SMEM
        ],
        out_specs=pl.BlockSpec((tm, 1), lambda i: (i, 0)),
        compiler_params=pltpu.CompilerParams(
            dimension_semantics=("parallel",),       # shard batch tiles across TCs (v7x)
            vmem_limit_bytes=32 * 1024 * 1024,       # keep double-buffered tiles legal on v5e
        ),
    )(x, w_row, b2)

    return out[:, 0]                                 # squeeze(-1) -> (B,)


def binomial_loss(predictions, targets, trials, mask=None):
    """Reference binomial NLL (plain JAX glue; not part of forward())."""
    # TODO(synk): could be fused into the same HBM sweep as the forward kernel.
    if mask is not None:
        predictions = predictions[mask]
        targets = targets[mask]
    eps = 1e-08
    p = jax.nn.sigmoid(predictions)
    loss = -(targets * jnp.log(p + eps) + (trials - targets) * jnp.log(1.0 - p + eps))
    return loss.mean()


if __name__ == "__main__":
    key = jax.random.PRNGKey(0)
    D = 32
    trials = 10

    kx, kw, kb, kx2 = jax.random.split(key, 4)

    # Deterministic init mimicking PyTorch nn.Linear default (uniform +/- 1/sqrt(D)).
    bound = 1.0 / jnp.sqrt(jnp.float32(D))
    weight = jax.random.uniform(kw, (1, D), jnp.float32, -bound, bound)
    bias = jax.random.uniform(kb, (1,), jnp.float32, -bound, bound)

    # Case 1: small batch, single block.
    B1 = 8
    x1 = jax.random.normal(kx, (B1, D), dtype=jnp.float32)
    logits1 = jax.block_until_ready(binomial_regression_head_forward(x1, weight, bias))
    ref1 = (x1 @ weight.T + bias)[:, 0]
    assert logits1.shape == (B1,)
    assert jnp.allclose(logits1, ref1, atol=1e-5, rtol=1e-5)

    # Case 2: exercise the batch grid (multiple tiles, non-divisible last tile).
    B2 = 20
    x2 = jax.random.normal(kx2, (B2, D), dtype=jnp.float32)
    logits2 = jax.block_until_ready(
        binomial_regression_head_forward(x2, weight, bias, tm=8)
    )
    ref2 = (x2 @ weight.T + bias)[:, 0]
    assert logits2.shape == (B2,)
    assert jnp.allclose(logits2, ref2, atol=1e-5, rtol=1e-5)

    # Sanity: loss runs on the kernel output.
    targets = jnp.clip(jnp.round(jax.nn.sigmoid(ref1) * trials), 0, trials)
    _ = jax.block_until_ready(binomial_loss(logits1, targets, trials))

    print("KERNEL_OK")
</pallas_src>

<mosaic_0001>
module attributes {stable_mosaic.version = 11 : i64} {
  func.func @_linear_head_kernel(%arg0: i32, %arg1: memref<8x32xf32, #tpu.memory_space<vmem>>, %arg2: memref<1x32xf32, #tpu.memory_space<vmem>>, %arg3: memref<1x1xf32, #tpu.memory_space<smem>>, %arg4: memref<8x1xf32, #tpu.memory_space<vmem>>) attributes {dimension_semantics = [#tpu.dimension_semantics<parallel>], iteration_bounds = array<i64: 1>, scalar_prefetch = 0 : i64, scratch_operands = 0 : i64, tpu.core_type = #tpu.core_type<tc>, window_params = [{transform_indices = @transform_0, window_bounds = array<i64: 8, 32>}, {pipeline_mode = #tpu.pipeline_mode<synchronous>, transform_indices = @transform_1, window_bounds = array<i64: 1, 32>}, {transform_indices = @transform_2, window_bounds = array<i64: 1, 1>}, {transform_indices = @transform_3, window_bounds = array<i64: 8, 1>}]} {
    %c0 = arith.constant 0 : index
    %c0_0 = arith.constant 0 : index
    %0 = vector.load %arg1[%c0, %c0_0] : memref<8x32xf32, #tpu.memory_space<vmem>>, vector<8x32xf32>
    %c0_1 = arith.constant 0 : index
    %c0_2 = arith.constant 0 : index
    %1 = vector.load %arg2[%c0_1, %c0_2] : memref<1x32xf32, #tpu.memory_space<vmem>>, vector<1x32xf32>
    %2 = vector.broadcast %1 : vector<1x32xf32> to vector<8x32xf32>
    %3 = arith.mulf %0, %2 : vector<8x32xf32>
    %cst = arith.constant dense<0.000000e+00> : vector<8xf32>
    %4 = vector.multi_reduction <add>, %3, %cst [1] : vector<8x32xf32> to vector<8xf32>
    %5 = vector.shape_cast %4 : vector<8xf32> to vector<8x1xf32>
    %c0_3 = arith.constant 0 : index
    %c0_4 = arith.constant 0 : index
    %6 = memref.load %arg3[%c0_3, %c0_4] : memref<1x1xf32, #tpu.memory_space<smem>>
    %7 = vector.broadcast %6 : f32 to vector<8x1xf32>
    %8 = arith.addf %5, %7 : vector<8x1xf32>
    %c0_5 = arith.constant 0 : index
    %c0_6 = arith.constant 0 : index
    %9 = vector.load %arg4[%c0_5, %c0_6] : memref<8x1xf32, #tpu.memory_space<vmem>>, vector<8x1xf32>
    tpu.vector_store %arg4[%c0_5, %c0_6], %8 {strides = array<i32>} : memref<8x1xf32, #tpu.memory_space<vmem>>, vector<8x1xf32>,
    return
  }
  func.func @transform_0(%arg0: i32) -> (i32, i32) {
    %c0_i32 = arith.constant 0 : i32
    %c0_i32_0 = arith.constant 0 : i32
    return %arg0, %c0_i32 : i32, i32
  }
  func.func @transform_1(%arg0: i32) -> (i32, i32) {
    %c0_i32 = arith.constant 0 : i32
    %c0_i32_0 = arith.constant 0 : i32
    %c0_i32_1 = arith.constant 0 : i32
    return %c0_i32, %c0_i32_0 : i32, i32
  }
  func.func @transform_2(%arg0: i32) -> (i32, i32) {
    %c0_i32 = arith.constant 0 : i32
    %c0_i32_0 = arith.constant 0 : i32
    %c0_i32_1 = arith.constant 0 : i32
    return %c0_i32, %c0_i32_0 : i32, i32
  }
  func.func @transform_3(%arg0: i32) -> (i32, i32) {
    %c0_i32 = arith.constant 0 : i32
    %c0_i32_0 = arith.constant 0 : i32
    return %arg0, %c0_i32 : i32, i32
  }
}

</mosaic_0001>

<bundles_post_ra>
// kernel: tpu_custom_call.1
= control target key start
LH: loop header
LB: loop body
LE: loop exit
PB: predicated region body
PF: predicated region fallthrough
CT: control target
= control target key end

     0   :  { %9 = vsyncpa [#allocation4], 0  ;;  %s77_s15 = smov [#allocation3]   ;;  %s110_s0 = inlined_call_operand.hbm [shape: f32[8,32], index: 0, kind: input, shape index: {}]   ;;  %s111_s1 = inlined_call_operand.vmem [shape: f32[1,32], index: 1, kind: input, shape index: {}]   ;;  %s112_s2 = inlined_call_operand.<no memory space> [shape: f32[1,1], index: 2, kind: input, shape index: {}]   ;;  %s113_s3 = inlined_call_operand.vmem [shape: f32[8,1], index: 3, kind: output, shape index: {}]  }
   0x1   :  { %s15_s14 = sshll.u32 %s110_s0, 4  ;;  %s17_s16 = sshll.u32 %s77_s15, 4  ;;  %s16_s14 = int_to_ptr.hbm [resolvable:$true] %s15_s14  ;;  %s18_s16 = int_to_ptr.vmem [resolvable:$true] %s17_s16 }
   0x2   :  { %20 = dma.hbm_to_vmem [thread:$0]  %s16_s14, 128, %s18_s16, [#allocation4]  }
   0x3   :  { %75 = dma.done.wait [#allocation4], 128  }
   0x4   :  { %76 = vsyncadd [#allocation4], 4294967168  ;;  %v29_v0 = vld [vmem:[#allocation3] sm:$0xff]  ;;  %vm35_vm0 = vcmask 261120   ;;  %v40_v4 = vstv %s112_s2  ;;  %vm42_vm1 = vcmask 7168  }
   0x5   :  { %v50_v1 = vld [vmem:[%s111_s1] ss:$0 sm:$0xff] }
   0x6   :  { %v34_v2 = vmul.f32 %v50_v1, %v29_v0 }
   0x8   :  { %v36_v3 = vsel %vm35_vm0, %v34_v2, 0.0 }
   0x9   :  { %37 = vadd.xlane.f32.xlu0 %v36_v3 }
  0x7c   :  { %v38_v5 = vpop.xlane.xlu0 %37 }
  0x7d   :  { %v41_v6 = vadd.f32 %v40_v4, %v38_v5 }
  0x7f   :  { %43 = vst.msk [vmem:[%s113_s3] sm:$0xff] %vm42_vm1, %v41_v6 }
  0x80   :  { %48 = vsyncpa [#allocation4], 1 }

</bundles_post_ra>
